<compile_context>
chip_gen: v7x
topology: tpu7x:2x2x1
jax: 0.10.0
libtpu: 0.0.40
codegen_flags: <defaults>
</compile_context>

<pallas_src>
import functools

import numpy as np

import jax
import jax.numpy as jnp
from jax.experimental import pallas as pl
from jax.experimental.pallas import tpu as pltpu


# ---------------------------------------------------------------------------
# Host-side constant builders (weight re-layout for the fused-lane kernel).
# ---------------------------------------------------------------------------

def _banded_weights(w_hwio, W, cmax):
    """(K, K, cin, cout) HWIO conv weights -> K banded block matrices.

    B[ky][wi*cin + ci, wo*cout + co] = w[ky, wi - wo + P, ci, co], so for a
    fixed kernel row ky the whole horizontal (kx) extent of the convolution
    (including the implicit zero padding in W) is ONE matmul over the fused
    (w, ci) contraction dimension.  The contraction dim is zero-padded from
    W*cin to W*cmax so every layer shares the same weight shape (one buffer).
    """
    K, _, cin, cout = w_hwio.shape
    P = (K - 1) // 2
    wn = np.asarray(w_hwio, dtype=np.float32)
    B = np.zeros((K, W * cmax, W * cout), np.float32)
    for ky in range(K):
        for wo in range(W):
            for kx in range(K):
                wi = wo + kx - P
                if 0 <= wi < W:
                    B[ky, wi * cin:(wi + 1) * cin,
                         wo * cout:(wo + 1) * cout] = wn[ky, kx]
    return B


# ---------------------------------------------------------------------------
# Kernel.
# ---------------------------------------------------------------------------

def _vgg_block_kernel(nb_convs, N, H, W, Cin, Cout, K, pool, eps,
                      x_ref, w_ref, ab_ref, out_ref, pad_ref):
    f32 = jnp.float32
    P = (K - 1) // 2
    WC = W * Cout
    NH = N * H
    Hp = H + 2 * P
    lanes = pad_ref.shape[-1]           # W * max(Cin, Cout)
    inv_cnt = 1.0 / float(N * H * W)

    # Zero only the H halo rows, once (the W halo is folded into the banded
    # weight matrices, so there is no lane-side halo at all).
    if P > 0:
        zrow = jnp.zeros((N, P, lanes), f32)
        pad_ref[:, 0:P, :] = zrow
        pad_ref[:, P + H:Hp, :] = zrow
    # Full-lane input store (x is pre-padded to `lanes` lanes on the host).
    pad_ref[:, P:P + H, :] = x_ref[...]

    for i in range(nb_convs):
        # ---- Conv: K banded matmuls (one per kernel ROW), bf16 MXU, f32 acc.
        # All layers share the same (lanes, WC) weight shape (zero rows kill the
        # unused / stale input lanes), so the window load is always full-lane.
        acc = jnp.zeros((NH, WC), f32)
        for ky in range(K):
            win = pad_ref[:, ky:ky + H, :].reshape(NH, lanes)
            acc = acc + jnp.dot(win.astype(jnp.bfloat16), w_ref[i * K + ky],
                                preferred_element_type=f32)
        # Conv bias intentionally omitted: training-mode BatchNorm subtracts the
        # batch mean, so a per-channel constant cancels exactly.

        # ---- BatchNorm2d, training-mode batch stats, one pass (sum, sum-sq).
        s1 = jnp.sum(acc, axis=0, keepdims=True)            # (1, WC): per (w,c)
        s2 = jnp.sum(acc * acc, axis=0, keepdims=True)
        # Reduce over the W lane-groups with a log2(W) cyclic roll all-reduce on
        # the XLU; every lane ends up holding the full per-channel sum, already
        # broadcast back to the fused lane layout (no 0/1 HIGHEST matmuls, no
        # sparse-lane vregs).  Exact: f32 adds of the same terms.
        shift = Cout
        while shift < WC:
            s1 = s1 + pltpu.roll(s1, shift, axis=1)
            s2 = s2 + pltpu.roll(s2, shift, axis=1)
            shift *= 2
        mean = s1 * inv_cnt
        var = jnp.maximum(s2 * inv_cnt - mean * mean, 0.0)   # clamp (one-pass)
        gamma = ab_ref[2 * i:2 * i + 1, :]
        beta = ab_ref[2 * i + 1:2 * i + 2, :]
        scale = gamma * jax.lax.rsqrt(var + eps)
        shift_b = beta - mean * scale
        ybn = acc * scale + shift_b

        # ---- ELU (alpha = 1).  Clamp the exp argument so the dead branch can
        # never produce inf.  (exp(x)-1 vs expm1 differs by <1e-7 abs here.)
        y = jnp.where(ybn > 0, ybn, jnp.exp(jnp.minimum(ybn, 0.0)) - 1.0)

        if i < nb_convs - 1 or pool:
            # Write straight into the halo interior for the next layer / pool.
            pad_ref[:, P:P + H, :WC] = y.reshape(N, H, WC)
        else:
            out_ref[...] = y.reshape(N, H, WC)

    if pool:
        # MaxPool2d(2), H direction only: two strided sublane reads + max.
        # Output stays lane dense (W*Cout lanes); the W-pair max + even-block
        # compaction are done in the wrapper (drops the HIGHEST-precision 0/1
        # selection matmuls and their weight DMA entirely).
        Hh = H // 2
        a = pad_ref[:, pl.ds(P, Hh, 2), :WC]
        b = pad_ref[:, pl.ds(P + 1, Hh, 2), :WC]
        out_ref[...] = jnp.maximum(a, b)


# ---------------------------------------------------------------------------
# Wrapper.
# ---------------------------------------------------------------------------

def vgg_block_forward(x_nchw, params, *, kernel_size=3, pool=True, eps=1e-5):
    """VGGBlock forward.  NCHW in / NCHW out (PyTorch layout at the boundary)."""
    N, Cin, H, W = x_nchw.shape
    K = kernel_size
    P = (K - 1) // 2
    Cout = params[0]['w'].shape[-1]
    nb_convs = len(params)
    Cmax = max(Cin, Cout)
    lanes = W * Cmax
    WC = W * Cout
    assert W > 0 and (W & (W - 1)) == 0, "roll-based BN reduction needs 2^k W"
    if pool:
        assert H % 2 == 0 and W % 2 == 0

    # NCHW -> NHWC -> fused lane layout (N, H, W*Cin), zero-padded to W*Cmax
    # lanes so the kernel's initial store is a full-lane (unmasked) store.
    x_f = jnp.transpose(x_nchw, (0, 2, 3, 1)).astype(jnp.float32)
    x_f = x_f.reshape(N, H, W * Cin)
    if lanes > W * Cin:
        x_f = jnp.pad(x_f, ((0, 0), (0, 0), (0, lanes - W * Cin)))

    # Packed inputs: 3 buffers total (x, all conv weights, all BN affine params).
    bw = np.concatenate([_banded_weights(p['w'], W, Cmax) for p in params],
                        axis=0)                       # (nb*K, lanes, WC)
    bw = jnp.asarray(bw, dtype=jnp.bfloat16)          # bf16 MXU inputs, f32 acc
    ab_rows = []
    for p in params:
        ab_rows.append(np.tile(np.asarray(p['gamma'], np.float32).reshape(-1), W))
        ab_rows.append(np.tile(np.asarray(p['beta'], np.float32).reshape(-1), W))
    ab = jnp.asarray(np.stack(ab_rows), dtype=jnp.float32)   # (nb*2, WC)

    Ho = H // 2 if pool else H
    kernel = functools.partial(_vgg_block_kernel, nb_convs, N, H, W,
                               Cin, Cout, K, pool, eps)

    out_f = pl.pallas_call(
        kernel,
        out_shape=jax.ShapeDtypeStruct((N, Ho, WC), jnp.float32),
        in_specs=[pl.BlockSpec(memory_space=pltpu.MemorySpace.VMEM)] * 3,
        out_specs=pl.BlockSpec(memory_space=pltpu.MemorySpace.VMEM),
        scratch_shapes=[pltpu.VMEM((N, H + 2 * P, lanes), jnp.float32)],
        # Explicit VMEM budget (v7x: 64 MiB physical / 32 MiB default scoped).
        compiler_params=pltpu.CompilerParams(vmem_limit_bytes=32 * 1024 * 1024),
    )(x_f, bw, ab)

    if pool:
        Wo = W // 2
        # W-pair max + even-block compaction of the lane-dense kernel output.
        out = jnp.max(out_f.reshape(N, Ho, Wo, 2, Cout), axis=3)
    else:
        out = out_f.reshape(N, Ho, W, Cout)
    return jnp.transpose(out, (0, 3, 1, 2))                   # back to NCHW


# ---------------------------------------------------------------------------
# Params / reference.
# ---------------------------------------------------------------------------

def init_params(key, in_channels, out_channels, nb_convs, kernel_size=3):
    """Deterministic parameter init (shapes mirror the torch module)."""
    params = []
    for i in range(nb_convs):
        cin = in_channels if i == 0 else out_channels
        key, k1, k2, k3, k4 = jax.random.split(key, 5)
        # torch Conv2d weight is (out, in, kH, kW); kernel uses HWIO.
        w = 0.1 * jax.random.normal(
            k1, (kernel_size, kernel_size, cin, out_channels), jnp.float32)
        b = 0.1 * jax.random.normal(k2, (1, out_channels), jnp.float32)
        gamma = 1.0 + 0.1 * jax.random.normal(k3, (1, out_channels), jnp.float32)
        beta = 0.1 * jax.random.normal(k4, (1, out_channels), jnp.float32)
        params.append(dict(w=w, b=b, gamma=gamma, beta=beta))
    return params


def vgg_block_reference(x_nchw, params, *, pool=True, eps=1e-5):
    """Pure-JAX reference with matching precision (bf16 MXU inputs, f32 acc)."""
    x = jnp.transpose(x_nchw, (0, 2, 3, 1)).astype(jnp.float32)
    for p in params:
        y = jax.lax.conv_general_dilated(
            x.astype(jnp.bfloat16), p['w'].astype(jnp.bfloat16),
            window_strides=(1, 1), padding='SAME',
            dimension_numbers=('NHWC', 'HWIO', 'NHWC'),
            preferred_element_type=jnp.float32)
        y = y + p['b'].reshape(1, 1, 1, -1)
        mean = jnp.mean(y, axis=(0, 1, 2), keepdims=True)
        var = jnp.mean((y - mean) ** 2, axis=(0, 1, 2), keepdims=True)
        y = (y - mean) * jax.lax.rsqrt(var + eps)
        y = y * p['gamma'].reshape(1, 1, 1, -1) + p['beta'].reshape(1, 1, 1, -1)
        y = jnp.where(y > 0, y, jnp.expm1(y))
        x = y
    if pool:
        x = jax.lax.reduce_window(x, -jnp.inf, jax.lax.max,
                                  (1, 2, 2, 1), (1, 2, 2, 1), 'VALID')
    return jnp.transpose(x, (0, 3, 1, 2))


if __name__ == "__main__":
    key = jax.random.PRNGKey(0)
    kx, kp = jax.random.split(key)

    # VGGBlock(in=4, out=8, nb_convs=2); W * Cout = 128 -> fully dense lanes.
    N, Cin, Cout, H, W = 2, 4, 8, 16, 16
    nb_convs = 2

    x = jax.random.normal(kx, (N, Cin, H, W), jnp.float32)
    params = init_params(kp, Cin, Cout, nb_convs, kernel_size=3)

    out = vgg_block_forward(x, params, kernel_size=3, pool=True)
    out = jax.block_until_ready(out)
    assert out.shape == (N, Cout, H // 2, W // 2), out.shape

    ref = jax.block_until_ready(vgg_block_reference(x, params, pool=True))
    max_err = float(jnp.max(jnp.abs(out - ref)))
    assert jnp.allclose(out, ref, atol=1e-3, rtol=1e-3), max_err

    print("KERNEL_OK")
</pallas_src>

<mosaic_0001>
module attributes {stable_mosaic.version = 11 : i64} {
  func.func @_vgg_block_kernel(%arg0: memref<2x16x128xf32, #tpu.memory_space<vmem>>, %arg1: memref<6x128x128xbf16, #tpu.memory_space<vmem>>, %arg2: memref<4x128xf32, #tpu.memory_space<vmem>>, %arg3: memref<2x8x128xf32, #tpu.memory_space<vmem>>, %arg4: memref<2x18x128xf32, #tpu.memory_space<vmem>>) attributes {dimension_semantics = [], scalar_prefetch = 0 : i64, scratch_operands = 1 : i64, tpu.core_type = #tpu.core_type<tc>} {
    %cst = arith.constant 0.000000e+00 : f32
    %0 = vector.broadcast %cst : f32 to vector<2x1x128xf32>
    %c0 = arith.constant 0 : index
    %c0_0 = arith.constant 0 : index
    %c0_1 = arith.constant 0 : index
    %1 = vector.load %arg4[%c0, %c0_0, %c0_1] : memref<2x18x128xf32, #tpu.memory_space<vmem>>, vector<2x1x128xf32>
    tpu.vector_store %arg4[%c0, %c0_0, %c0_1], %0 {strides = array<i32>} : memref<2x18x128xf32, #tpu.memory_space<vmem>>, vector<2x1x128xf32>,
    %c0_2 = arith.constant 0 : index
    %c17 = arith.constant 17 : index
    %c0_3 = arith.constant 0 : index
    %2 = vector.load %arg4[%c0_2, %c17, %c0_3] : memref<2x18x128xf32, #tpu.memory_space<vmem>>, vector<2x1x128xf32>
    tpu.vector_store %arg4[%c0_2, %c17, %c0_3], %0 {strides = array<i32>} : memref<2x18x128xf32, #tpu.memory_space<vmem>>, vector<2x1x128xf32>,
    %c0_4 = arith.constant 0 : index
    %c0_5 = arith.constant 0 : index
    %c0_6 = arith.constant 0 : index
    %3 = vector.load %arg0[%c0_4, %c0_5, %c0_6] : memref<2x16x128xf32, #tpu.memory_space<vmem>>, vector<2x16x128xf32>
    %c0_7 = arith.constant 0 : index
    %c1 = arith.constant 1 : index
    %c0_8 = arith.constant 0 : index
    %4 = vector.load %arg4[%c0_7, %c1, %c0_8] : memref<2x18x128xf32, #tpu.memory_space<vmem>>, vector<2x16x128xf32>
    tpu.vector_store %arg4[%c0_7, %c1, %c0_8], %3 {strides = array<i32>} : memref<2x18x128xf32, #tpu.memory_space<vmem>>, vector<2x16x128xf32>,
    %cst_9 = arith.constant 0.000000e+00 : f32
    %5 = vector.broadcast %cst_9 : f32 to vector<32x128xf32>
    %c0_10 = arith.constant 0 : index
    %c0_11 = arith.constant 0 : index
    %c0_12 = arith.constant 0 : index
    %6 = vector.load %arg4[%c0_10, %c0_11, %c0_12] : memref<2x18x128xf32, #tpu.memory_space<vmem>>, vector<2x16x128xf32>
    %7 = vector.shape_cast %6 : vector<2x16x128xf32> to vector<32x128xf32>
    %8 = arith.truncf %7 : vector<32x128xf32> to vector<32x128xbf16>
    %c0_13 = arith.constant 0 : index
    %c0_14 = arith.constant 0 : index
    %c0_15 = arith.constant 0 : index
    %9 = vector.load %arg1[%c0_13, %c0_14, %c0_15] : memref<6x128x128xbf16, #tpu.memory_space<vmem>>, vector<1x128x128xbf16>
    %10 = vector.shape_cast %9 : vector<1x128x128xbf16> to vector<128x128xbf16>
    %cst_16 = arith.constant dense<0.000000e+00> : vector<32x128xf32>
    %11 = tpu.matmul %8, %10, %cst_16 {dimension_numbers = #tpu.dot_dimension_numbers<[1], [0], [0], [1], [0, 0, 1, 1], [], []>} : vector<32x128xbf16>, vector<128x128xbf16>, vector<32x128xf32> -> vector<32x128xf32>
    %12 = arith.addf %5, %11 : vector<32x128xf32>
    %c0_17 = arith.constant 0 : index
    %c1_18 = arith.constant 1 : index
    %c0_19 = arith.constant 0 : index
    %13 = vector.load %arg4[%c0_17, %c1_18, %c0_19] : memref<2x18x128xf32, #tpu.memory_space<vmem>>, vector<2x16x128xf32>
    %14 = vector.shape_cast %13 : vector<2x16x128xf32> to vector<32x128xf32>
    %15 = arith.truncf %14 : vector<32x128xf32> to vector<32x128xbf16>
    %c1_20 = arith.constant 1 : index
    %c0_21 = arith.constant 0 : index
    %c0_22 = arith.constant 0 : index
    %16 = vector.load %arg1[%c1_20, %c0_21, %c0_22] : memref<6x128x128xbf16, #tpu.memory_space<vmem>>, vector<1x128x128xbf16>
    %17 = vector.shape_cast %16 : vector<1x128x128xbf16> to vector<128x128xbf16>
    %cst_23 = arith.constant dense<0.000000e+00> : vector<32x128xf32>
    %18 = tpu.matmul %15, %17, %cst_23 {dimension_numbers = #tpu.dot_dimension_numbers<[1], [0], [0], [1], [0, 0, 1, 1], [], []>} : vector<32x128xbf16>, vector<128x128xbf16>, vector<32x128xf32> -> vector<32x128xf32>
    %19 = arith.addf %12, %18 : vector<32x128xf32>
    %c0_24 = arith.constant 0 : index
    %c2 = arith.constant 2 : index
    %c0_25 = arith.constant 0 : index
    %20 = vector.load %arg4[%c0_24, %c2, %c0_25] : memref<2x18x128xf32, #tpu.memory_space<vmem>>, vector<2x16x128xf32>
    %21 = vector.shape_cast %20 : vector<2x16x128xf32> to vector<32x128xf32>
    %22 = arith.truncf %21 : vector<32x128xf32> to vector<32x128xbf16>
    %c2_26 = arith.constant 2 : index
    %c0_27 = arith.constant 0 : index
    %c0_28 = arith.constant 0 : index
    %23 = vector.load %arg1[%c2_26, %c0_27, %c0_28] : memref<6x128x128xbf16, #tpu.memory_space<vmem>>, vector<1x128x128xbf16>
    %24 = vector.shape_cast %23 : vector<1x128x128xbf16> to vector<128x128xbf16>
    %cst_29 = arith.constant dense<0.000000e+00> : vector<32x128xf32>
    %25 = tpu.matmul %22, %24, %cst_29 {dimension_numbers = #tpu.dot_dimension_numbers<[1], [0], [0], [1], [0, 0, 1, 1], [], []>} : vector<32x128xbf16>, vector<128x128xbf16>, vector<32x128xf32> -> vector<32x128xf32>
    %26 = arith.addf %19, %25 : vector<32x128xf32>
    %cst_30 = arith.constant dense<0.000000e+00> : vector<128xf32>
    %27 = vector.multi_reduction <add>, %26, %cst_30 [0] : vector<32x128xf32> to vector<128xf32>
    %28 = vector.shape_cast %27 : vector<128xf32> to vector<1x128xf32>
    %29 = arith.mulf %26, %26 : vector<32x128xf32>
    %cst_31 = arith.constant dense<0.000000e+00> : vector<128xf32>
    %30 = vector.multi_reduction <add>, %29, %cst_31 [0] : vector<32x128xf32> to vector<128xf32>
    %31 = vector.shape_cast %30 : vector<128xf32> to vector<1x128xf32>
    %c8_i32 = arith.constant 8 : i32
    %32 = tpu.dynamic_rotate %28 by %c8_i32 dim 1 : vector<1x128xf32>, i32 -> vector<1x128xf32>
    %33 = arith.addf %28, %32 : vector<1x128xf32>
    %c8_i32_32 = arith.constant 8 : i32
    %34 = tpu.dynamic_rotate %31 by %c8_i32_32 dim 1 : vector<1x128xf32>, i32 -> vector<1x128xf32>
    %35 = arith.addf %31, %34 : vector<1x128xf32>
    %c16_i32 = arith.constant 16 : i32
    %36 = tpu.dynamic_rotate %33 by %c16_i32 dim 1 : vector<1x128xf32>, i32 -> vector<1x128xf32>
    %37 = arith.addf %33, %36 : vector<1x128xf32>
    %c16_i32_33 = arith.constant 16 : i32
    %38 = tpu.dynamic_rotate %35 by %c16_i32_33 dim 1 : vector<1x128xf32>, i32 -> vector<1x128xf32>
    %39 = arith.addf %35, %38 : vector<1x128xf32>
    %c32_i32 = arith.constant 32 : i32
    %40 = tpu.dynamic_rotate %37 by %c32_i32 dim 1 : vector<1x128xf32>, i32 -> vector<1x128xf32>
    %41 = arith.addf %37, %40 : vector<1x128xf32>
    %c32_i32_34 = arith.constant 32 : i32
    %42 = tpu.dynamic_rotate %39 by %c32_i32_34 dim 1 : vector<1x128xf32>, i32 -> vector<1x128xf32>
    %43 = arith.addf %39, %42 : vector<1x128xf32>
    %c64_i32 = arith.constant 64 : i32
    %44 = tpu.dynamic_rotate %41 by %c64_i32 dim 1 : vector<1x128xf32>, i32 -> vector<1x128xf32>
    %45 = arith.addf %41, %44 : vector<1x128xf32>
    %c64_i32_35 = arith.constant 64 : i32
    %46 = tpu.dynamic_rotate %43 by %c64_i32_35 dim 1 : vector<1x128xf32>, i32 -> vector<1x128xf32>
    %47 = arith.addf %43, %46 : vector<1x128xf32>
    %cst_36 = arith.constant 0.001953125 : f32
    %48 = vector.broadcast %cst_36 : f32 to vector<1x128xf32>
    %49 = arith.mulf %45, %48 : vector<1x128xf32>
    %cst_37 = arith.constant 0.001953125 : f32
    %50 = vector.broadcast %cst_37 : f32 to vector<1x128xf32>
    %51 = arith.mulf %47, %50 : vector<1x128xf32>
    %52 = arith.mulf %49, %49 : vector<1x128xf32>
    %53 = arith.subf %51, %52 : vector<1x128xf32>
    %cst_38 = arith.constant 0.000000e+00 : f32
    %54 = vector.broadcast %cst_38 : f32 to vector<1x128xf32>
    %55 = arith.maximumf %53, %54 : vector<1x128xf32>
    %c0_39 = arith.constant 0 : index
    %c0_40 = arith.constant 0 : index
    %56 = vector.load %arg2[%c0_39, %c0_40] : memref<4x128xf32, #tpu.memory_space<vmem>>, vector<1x128xf32>
    %c1_41 = arith.constant 1 : index
    %c0_42 = arith.constant 0 : index
    %57 = vector.load %arg2[%c1_41, %c0_42] : memref<4x128xf32, #tpu.memory_space<vmem>>, vector<1x128xf32>
    %cst_43 = arith.constant 9.99999974E-6 : f32
    %58 = vector.broadcast %cst_43 : f32 to vector<1x128xf32>
    %59 = arith.addf %55, %58 : vector<1x128xf32>
    %60 = math.rsqrt %59 : vector<1x128xf32>
    %61 = arith.mulf %56, %60 : vector<1x128xf32>
    %62 = arith.mulf %49, %61 : vector<1x128xf32>
    %63 = arith.subf %57, %62 : vector<1x128xf32>
    %64 = vector.broadcast %61 : vector<1x128xf32> to vector<32x128xf32>
    %65 = arith.mulf %26, %64 : vector<32x128xf32>
    %66 = vector.broadcast %63 : vector<1x128xf32> to vector<32x128xf32>
    %67 = arith.addf %65, %66 : vector<32x128xf32>
    %cst_44 = arith.constant 0.000000e+00 : f32
    %68 = vector.broadcast %cst_44 : f32 to vector<32x128xf32>
    %69 = arith.cmpf ogt, %67, %68 : vector<32x128xf32>
    %cst_45 = arith.constant 0.000000e+00 : f32
    %70 = vector.broadcast %cst_45 : f32 to vector<32x128xf32>
    %71 = arith.minimumf %67, %70 : vector<32x128xf32>
    %72 = math.exp %71 : vector<32x128xf32>
    %cst_46 = arith.constant 1.000000e+00 : f32
    %73 = vector.broadcast %cst_46 : f32 to vector<32x128xf32>
    %74 = arith.subf %72, %73 : vector<32x128xf32>
    %75 = arith.select %69, %67, %74 : vector<32x128xi1>, vector<32x128xf32>
    %76 = vector.shape_cast %75 : vector<32x128xf32> to vector<2x16x128xf32>
    %c0_47 = arith.constant 0 : index
    %c1_48 = arith.constant 1 : index
    %c0_49 = arith.constant 0 : index
    %77 = vector.load %arg4[%c0_47, %c1_48, %c0_49] : memref<2x18x128xf32, #tpu.memory_space<vmem>>, vector<2x16x128xf32>
    tpu.vector_store %arg4[%c0_47, %c1_48, %c0_49], %76 {strides = array<i32>} : memref<2x18x128xf32, #tpu.memory_space<vmem>>, vector<2x16x128xf32>,
    %cst_50 = arith.constant 0.000000e+00 : f32
    %78 = vector.broadcast %cst_50 : f32 to vector<32x128xf32>
    %c0_51 = arith.constant 0 : index
    %c0_52 = arith.constant 0 : index
    %c0_53 = arith.constant 0 : index
    %79 = vector.load %arg4[%c0_51, %c0_52, %c0_53] : memref<2x18x128xf32, #tpu.memory_space<vmem>>, vector<2x16x128xf32>
    %80 = vector.shape_cast %79 : vector<2x16x128xf32> to vector<32x128xf32>
    %81 = arith.truncf %80 : vector<32x128xf32> to vector<32x128xbf16>
    %c3 = arith.constant 3 : index
    %c0_54 = arith.constant 0 : index
    %c0_55 = arith.constant 0 : index
    %82 = vector.load %arg1[%c3, %c0_54, %c0_55] : memref<6x128x128xbf16, #tpu.memory_space<vmem>>, vector<1x128x128xbf16>
    %83 = vector.shape_cast %82 : vector<1x128x128xbf16> to vector<128x128xbf16>
    %cst_56 = arith.constant dense<0.000000e+00> : vector<32x128xf32>
    %84 = tpu.matmul %81, %83, %cst_56 {dimension_numbers = #tpu.dot_dimension_numbers<[1], [0], [0], [1], [0, 0, 1, 1], [], []>} : vector<32x128xbf16>, vector<128x128xbf16>, vector<32x128xf32> -> vector<32x128xf32>
    %85 = arith.addf %78, %84 : vector<32x128xf32>
    %c0_57 = arith.constant 0 : index
    %c1_58 = arith.constant 1 : index
    %c0_59 = arith.constant 0 : index
    %86 = vector.load %arg4[%c0_57, %c1_58, %c0_59] : memref<2x18x128xf32, #tpu.memory_space<vmem>>, vector<2x16x128xf32>
    %87 = vector.shape_cast %86 : vector<2x16x128xf32> to vector<32x128xf32>
    %88 = arith.truncf %87 : vector<32x128xf32> to vector<32x128xbf16>
    %c4 = arith.constant 4 : index
    %c0_60 = arith.constant 0 : index
    %c0_61 = arith.constant 0 : index
    %89 = vector.load %arg1[%c4, %c0_60, %c0_61] : memref<6x128x128xbf16, #tpu.memory_space<vmem>>, vector<1x128x128xbf16>
    %90 = vector.shape_cast %89 : vector<1x128x128xbf16> to vector<128x128xbf16>
    %cst_62 = arith.constant dense<0.000000e+00> : vector<32x128xf32>
    %91 = tpu.matmul %88, %90, %cst_62 {dimension_numbers = #tpu.dot_dimension_numbers<[1], [0], [0], [1], [0, 0, 1, 1], [], []>} : vector<32x128xbf16>, vector<128x128xbf16>, vector<32x128xf32> -> vector<32x128xf32>
    %92 = arith.addf %85, %91 : vector<32x128xf32>
    %c0_63 = arith.constant 0 : index
    %c2_64 = arith.constant 2 : index
    %c0_65 = arith.constant 0 : index
    %93 = vector.load %arg4[%c0_63, %c2_64, %c0_65] : memref<2x18x128xf32, #tpu.memory_space<vmem>>, vector<2x16x128xf32>
    %94 = vector.shape_cast %93 : vector<2x16x128xf32> to vector<32x128xf32>
    %95 = arith.truncf %94 : vector<32x128xf32> to vector<32x128xbf16>
    %c5 = arith.constant 5 : index
    %c0_66 = arith.constant 0 : index
    %c0_67 = arith.constant 0 : index
    %96 = vector.load %arg1[%c5, %c0_66, %c0_67] : memref<6x128x128xbf16, #tpu.memory_space<vmem>>, vector<1x128x128xbf16>
    %97 = vector.shape_cast %96 : vector<1x128x128xbf16> to vector<128x128xbf16>
    %cst_68 = arith.constant dense<0.000000e+00> : vector<32x128xf32>
    %98 = tpu.matmul %95, %97, %cst_68 {dimension_numbers = #tpu.dot_dimension_numbers<[1], [0], [0], [1], [0, 0, 1, 1], [], []>} : vector<32x128xbf16>, vector<128x128xbf16>, vector<32x128xf32> -> vector<32x128xf32>
    %99 = arith.addf %92, %98 : vector<32x128xf32>
    %cst_69 = arith.constant dense<0.000000e+00> : vector<128xf32>
    %100 = vector.multi_reduction <add>, %99, %cst_69 [0] : vector<32x128xf32> to vector<128xf32>
    %101 = vector.shape_cast %100 : vector<128xf32> to vector<1x128xf32>
    %102 = arith.mulf %99, %99 : vector<32x128xf32>
    %cst_70 = arith.constant dense<0.000000e+00> : vector<128xf32>
    %103 = vector.multi_reduction <add>, %102, %cst_70 [0] : vector<32x128xf32> to vector<128xf32>
    %104 = vector.shape_cast %103 : vector<128xf32> to vector<1x128xf32>
    %c8_i32_71 = arith.constant 8 : i32
    %105 = tpu.dynamic_rotate %101 by %c8_i32_71 dim 1 : vector<1x128xf32>, i32 -> vector<1x128xf32>
    %106 = arith.addf %101, %105 : vector<1x128xf32>
    %c8_i32_72 = arith.constant 8 : i32
    %107 = tpu.dynamic_rotate %104 by %c8_i32_72 dim 1 : vector<1x128xf32>, i32 -> vector<1x128xf32>
    %108 = arith.addf %104, %107 : vector<1x128xf32>
    %c16_i32_73 = arith.constant 16 : i32
    %109 = tpu.dynamic_rotate %106 by %c16_i32_73 dim 1 : vector<1x128xf32>, i32 -> vector<1x128xf32>
    %110 = arith.addf %106, %109 : vector<1x128xf32>
    %c16_i32_74 = arith.constant 16 : i32
    %111 = tpu.dynamic_rotate %108 by %c16_i32_74 dim 1 : vector<1x128xf32>, i32 -> vector<1x128xf32>
    %112 = arith.addf %108, %111 : vector<1x128xf32>
    %c32_i32_75 = arith.constant 32 : i32
    %113 = tpu.dynamic_rotate %110 by %c32_i32_75 dim 1 : vector<1x128xf32>, i32 -> vector<1x128xf32>
    %114 = arith.addf %110, %113 : vector<1x128xf32>
    %c32_i32_76 = arith.constant 32 : i32
    %115 = tpu.dynamic_rotate %112 by %c32_i32_76 dim 1 : vector<1x128xf32>, i32 -> vector<1x128xf32>
    %116 = arith.addf %112, %115 : vector<1x128xf32>
    %c64_i32_77 = arith.constant 64 : i32
    %117 = tpu.dynamic_rotate %114 by %c64_i32_77 dim 1 : vector<1x128xf32>, i32 -> vector<1x128xf32>
    %118 = arith.addf %114, %117 : vector<1x128xf32>
    %c64_i32_78 = arith.constant 64 : i32
    %119 = tpu.dynamic_rotate %116 by %c64_i32_78 dim 1 : vector<1x128xf32>, i32 -> vector<1x128xf32>
    %120 = arith.addf %116, %119 : vector<1x128xf32>
    %cst_79 = arith.constant 0.001953125 : f32
    %121 = vector.broadcast %cst_79 : f32 to vector<1x128xf32>
    %122 = arith.mulf %118, %121 : vector<1x128xf32>
    %cst_80 = arith.constant 0.001953125 : f32
    %123 = vector.broadcast %cst_80 : f32 to vector<1x128xf32>
    %124 = arith.mulf %120, %123 : vector<1x128xf32>
    %125 = arith.mulf %122, %122 : vector<1x128xf32>
    %126 = arith.subf %124, %125 : vector<1x128xf32>
    %cst_81 = arith.constant 0.000000e+00 : f32
    %127 = vector.broadcast %cst_81 : f32 to vector<1x128xf32>
    %128 = arith.maximumf %126, %127 : vector<1x128xf32>
    %c2_82 = arith.constant 2 : index
    %c0_83 = arith.constant 0 : index
    %129 = vector.load %arg2[%c2_82, %c0_83] : memref<4x128xf32, #tpu.memory_space<vmem>>, vector<1x128xf32>
    %c3_84 = arith.constant 3 : index
    %c0_85 = arith.constant 0 : index
    %130 = vector.load %arg2[%c3_84, %c0_85] : memref<4x128xf32, #tpu.memory_space<vmem>>, vector<1x128xf32>
    %cst_86 = arith.constant 9.99999974E-6 : f32
    %131 = vector.broadcast %cst_86 : f32 to vector<1x128xf32>
    %132 = arith.addf %128, %131 : vector<1x128xf32>
    %133 = math.rsqrt %132 : vector<1x128xf32>
    %134 = arith.mulf %129, %133 : vector<1x128xf32>
    %135 = arith.mulf %122, %134 : vector<1x128xf32>
    %136 = arith.subf %130, %135 : vector<1x128xf32>
    %137 = vector.broadcast %134 : vector<1x128xf32> to vector<32x128xf32>
    %138 = arith.mulf %99, %137 : vector<32x128xf32>
    %139 = vector.broadcast %136 : vector<1x128xf32> to vector<32x128xf32>
    %140 = arith.addf %138, %139 : vector<32x128xf32>
    %cst_87 = arith.constant 0.000000e+00 : f32
    %141 = vector.broadcast %cst_87 : f32 to vector<32x128xf32>
    %142 = arith.cmpf ogt, %140, %141 : vector<32x128xf32>
    %cst_88 = arith.constant 0.000000e+00 : f32
    %143 = vector.broadcast %cst_88 : f32 to vector<32x128xf32>
    %144 = arith.minimumf %140, %143 : vector<32x128xf32>
    %145 = math.exp %144 : vector<32x128xf32>
    %cst_89 = arith.constant 1.000000e+00 : f32
    %146 = vector.broadcast %cst_89 : f32 to vector<32x128xf32>
    %147 = arith.subf %145, %146 : vector<32x128xf32>
    %148 = arith.select %142, %140, %147 : vector<32x128xi1>, vector<32x128xf32>
    %149 = vector.shape_cast %148 : vector<32x128xf32> to vector<2x16x128xf32>
    %c0_90 = arith.constant 0 : index
    %c1_91 = arith.constant 1 : index
    %c0_92 = arith.constant 0 : index
    %150 = vector.load %arg4[%c0_90, %c1_91, %c0_92] : memref<2x18x128xf32, #tpu.memory_space<vmem>>, vector<2x16x128xf32>
    tpu.vector_store %arg4[%c0_90, %c1_91, %c0_92], %149 {strides = array<i32>} : memref<2x18x128xf32, #tpu.memory_space<vmem>>, vector<2x16x128xf32>,
    %c0_93 = arith.constant 0 : index
    %c1_94 = arith.constant 1 : index
    %c0_95 = arith.constant 0 : index
    %151 = tpu.strided_load %arg4[%c0_93, %c1_94, %c0_95] {strides = array<i32: 1, 2, 1>} : memref<2x18x128xf32, #tpu.memory_space<vmem>>, vector<2x8x128xf32>
    %c0_96 = arith.constant 0 : index
    %c2_97 = arith.constant 2 : index
    %c0_98 = arith.constant 0 : index
    %152 = tpu.strided_load %arg4[%c0_96, %c2_97, %c0_98] {strides = array<i32: 1, 2, 1>} : memref<2x18x128xf32, #tpu.memory_space<vmem>>, vector<2x8x128xf32>
    %153 = arith.maximumf %151, %152 : vector<2x8x128xf32>
    %c0_99 = arith.constant 0 : index
    %c0_100 = arith.constant 0 : index
    %c0_101 = arith.constant 0 : index
    %154 = vector.load %arg3[%c0_99, %c0_100, %c0_101] : memref<2x8x128xf32, #tpu.memory_space<vmem>>, vector<2x8x128xf32>
    tpu.vector_store %arg3[%c0_99, %c0_100, %c0_101], %153 {strides = array<i32>} : memref<2x8x128xf32, #tpu.memory_space<vmem>>, vector<2x8x128xf32>,
    return
  }
}

</mosaic_0001>

<bundles_post_ra>
// kernel: tpu_custom_call.1
= control target key start
LH: loop header
LB: loop body
LE: loop exit
PB: predicated region body
PF: predicated region fallthrough
CT: control target
= control target key end

     0   :  { %8 = vsyncpa [#allocation4], 0  ;;  %s1573_s0 = inlined_call_operand.hbm [shape: f32[2,16,128], index: 0, kind: input, shape index: {}]   ;;  %s1574_s1 = inlined_call_operand.hbm [shape: bf16[6,128,128], index: 1, kind: input, shape index: {}]   ;;  %s1575_s2 = inlined_call_operand.vmem [shape: f32[4,128], index: 2, kind: input, shape index: {}]   ;;  %s1576_s3 = inlined_call_operand.hbm [shape: f32[2,8,128], index: 3, kind: output, shape index: {}]  }
   0x1   :  { %9 = vsyncpa [#allocation7], 0 }
   0x2   :  { %10 = vsyncpa [#allocation5], 0  ;;  %s1419_s12 = smov [#allocation3]   ;;  %s1347_s16 = scalar_lea.hbm %s1573_s0, 512 }
   0x3   :  { %s16_s13 = sshll.u32 %s1419_s12, 4  ;;  %p1348_p0 = scmp.ne.s32.totalorder %s1573_s0, %s1347_s16  ;;  %s17_s13 = int_to_ptr.vmem [resolvable:$true] %s16_s13 }
   0x4   :  { %p1351_p1 = scmp.lt.u32.totalorder %s1347_s16, %s1573_s0 }
   0x6   :  { %p1353_p2 = pnand %p1351_p1, %p1348_p0 }
   0x8   :  { %1356 = shalt.err (!%p1353_p2)
}
   0x9   :  { %s1357_s21 = scalar_lea.vmem %s17_s13, 512  ;;  %p1362_p4 = scmp.lt.s32.totalorder %s17_s13, %s17_s13 }
   0xa   :  { %p1358_p3 = scmp.ne.s32.totalorder %s17_s13, %s1357_s21  ;;  %p1363_p5 = scmp.lt.s32.totalorder %s1357_s21, %s1357_s21 }
   0xc   :  { %p1364_p6 = por %p1363_p5, %p1362_p4 }
   0xe   :  { %p1365_p7 = pnand %p1364_p6, %p1358_p3 }
  0x10   :  { %1368 = shalt.err (!%p1365_p7)
}
  0x11   :  { %s1420_s22 = smov 128   ;;  %s1421_s23 = smov 8  }
  0x12   :  { %22 = dma.hbm_to_vmem [thread:$0]  %s1573_s0, 512, %s17_s13, [#allocation4], %s1420_s22, %s1420_s22, %s1421_s23  }
  0x13   :  { %s1422_s26 = smov [#allocation6]   ;;  %s1369_s30 = scalar_lea.hbm %s1574_s1, 6144 }
  0x14   :  { %s28_s27 = sshll.u32 %s1422_s26, 4  ;;  %p1370_p8 = scmp.ne.s32.totalorder %s1574_s1, %s1369_s30  ;;  %s29_s27 = int_to_ptr.vmem [resolvable:$true] %s28_s27 }
  0x15   :  { %p1373_p9 = scmp.lt.u32.totalorder %s1369_s30, %s1574_s1 }
  0x17   :  { %p1375_p10 = pnand %p1373_p9, %p1370_p8 }
  0x19   :  { %1378 = shalt.err (!%p1375_p10)
}
  0x1a   :  { %s1379_s8 = scalar_lea.vmem %s29_s27, 6144  ;;  %p1384_p12 = scmp.lt.s32.totalorder %s29_s27, %s29_s27 }
  0x1b   :  { %p1380_p11 = scmp.ne.s32.totalorder %s29_s27, %s1379_s8  ;;  %p1385_p13 = scmp.lt.s32.totalorder %s1379_s8, %s1379_s8 }
  0x1d   :  { %p1386_p0 = por %p1385_p13, %p1384_p12 }
  0x1f   :  { %p1387_p1 = pnand %p1386_p0, %p1380_p11 }
  0x21   :  { %1390 = shalt.err (!%p1387_p1)
}
  0x22   :  { %s1423_s0 = smov 64   ;;  %s1424_s9 = smov 4  }
  0x23   :  { %34 = dma.hbm_to_vmem [thread:$0]  %s1574_s1, 6144, %s29_s27, [#allocation7], %s1423_s0, %s1423_s0, %s1424_s9  }
  0x24   :  { %1413 = dma.done.wait [#allocation4], 512  }
  0x25   :  { %1414 = vsyncadd [#allocation4], 4294966784 }
  0x26   :  { %1415 = dma.done.wait [#allocation7], 6144  }
  0x27   :  { %1416 = vsyncadd [#allocation7], 4294961152  ;;  %v1425_v0 = vmov 0.0   ;;  %v1279_v1 = vld [vmem:[#allocation6 + $0x40] sm:$0xff]   ;;  %v1280_v2 = vld [vmem:[#allocation6 + $0x48] sm:$0xff]   ;;  %s1426_s1 = smov 16  }
  0x28   :  { %44 = vst [vmem:[#allocation2] sm:$0x1] %v1425_v0  ;;  %45 = vst [vmem:[#allocation2 + $0x18] sm:$0x1] %v1425_v0  ;;  %1133 = vmatprep.subr.bf16.mxu0 %v1279_v1  ;;  %v1281_v3 = vld [vmem:[#allocation6 + $0x50] sm:$0xff]   ;;  %v1282_v4 = vld [vmem:[#allocation6 + $0x58] sm:$0xff]  }
  0x29   :  { %46 = vst [vmem:[#allocation2 + $0x11] sm:$0x1] %v1425_v0  ;;  %47 = vst [vmem:[#allocation2 + $0x29] sm:$0x1] %v1425_v0  ;;  %1134 = vmatpush3.bf16.msra.mxu0 %v1279_v1  ;;  %v48_v5 = vld [vmem:[#allocation3] sm:$0xff]  ;;  %v49_v6 = vld [vmem:[#allocation3 + $0x8] sm:$0xff] }
  0x2a   :  { %1135 = vmatprep.subr.bf16.mxu0 %v1280_v2  ;;  %52 = vst [vmem:[#allocation2 + $0x1] sm:$0xff] %v48_v5  ;;  %53 = vst [vmem:[#allocation2 + $0x9] sm:$0xff] %v49_v6  ;;  %v82_v7 = vpack.c.bf16 %v49_v6, %v48_v5  ;;  %v50_v8 = vld [vmem:[#allocation3 + $0x10] sm:$0xff]  ;;  %v51_v9 = vld [vmem:[#allocation3 + $0x18] sm:$0xff]  ;;  %s1427_s12 = smov 32  }
  0x2b   :  { %54 = vst [vmem:[#allocation2 + $0x19] sm:$0xff] %v50_v8  ;;  %55 = vst [vmem:[#allocation2 + $0x21] sm:$0xff] %v51_v9  ;;  %v1283_v10 = vld [vmem:[#allocation6 + $0x60] sm:$0xff]   ;;  %v1284_v11 = vld [vmem:[#allocation6 + $0x68] sm:$0xff]   ;;  %v83_v17 = vpack.c.bf16 %v51_v9, %v50_v8 }
  0x2c   :  { %1149 = vmatprep.mubr.bf16.mxu0 %v82_v7  ;;  %v1285_v12 = vld [vmem:[#allocation6 + $0x70] sm:$0xff]   ;;  %v1286_v13 = vld [vmem:[#allocation6 + $0x78] sm:$0xff]   ;;  %v1287_v14 = vld [vmem:[#allocation6] sm:$0xff]  }
  0x2d   :  { %1136 = vmatpush3.bf16.msra.mxu0 %v1280_v2  ;;  %v1288_v18 = vld [vmem:[#allocation6 + $0x8] sm:$0xff]   ;;  %v1289_v20 = vld [vmem:[#allocation6 + $0x10] sm:$0xff]   ;;  %v1290_v21 = vld [vmem:[#allocation6 + $0x18] sm:$0xff]  }
  0x2e   :  { %1137 = vmatprep.subr.bf16.mxu0 %v1281_v3  ;;  %v1291_v22 = vld [vmem:[#allocation6 + $0x20] sm:$0xff]   ;;  %v1292_v23 = vld [vmem:[#allocation6 + $0x28] sm:$0xff]   ;;  %v1293_v24 = vld [vmem:[#allocation6 + $0x30] sm:$0xff]  }
  0x2f   :  { %v1294_v25 = vld [vmem:[#allocation6 + $0x38] sm:$0xff]   ;;  %v1295_v28 = vld [vmem:[#allocation6 + $0x80] sm:$0xff]   ;;  %v1296_v33 = vld [vmem:[#allocation6 + $0x88] sm:$0xff]  }
  0x30   :  { %v1297_v34 = vld [vmem:[#allocation6 + $0x90] sm:$0xff]   ;;  %v1298_v35 = vld [vmem:[#allocation6 + $0x98] sm:$0xff]   ;;  %v1299_v36 = vld [vmem:[#allocation6 + $0xa0] sm:$0xff]  }
  0x31   :  { %1138 = vmatpush3.bf16.msra.mxu0 %v1281_v3  ;;  %v56_v15 = vld [vmem:[#allocation2] sm:$0xff]  ;;  %v57_v16 = vld [vmem:[#allocation2 + $0x8] sm:$0xff]  ;;  %v1300_v37 = vld [vmem:[#allocation6 + $0xa8] sm:$0xff]  }
  0x32   :  { %1139 = vmatprep.subr.bf16.mxu0 %v1282_v4  ;;  %v60_v19 = vpack.c.bf16 %v57_v16, %v56_v15  ;;  %v58_v26 = vld [vmem:[#allocation2 + $0x18] sm:$0xff]  ;;  %v59_v27 = vld [vmem:[#allocation2 + $0x20] sm:$0xff]  ;;  %v296_v30 = vld [vmem:[#allocation2 + $0xa] sm:$0xff] }
  0x33   :  { %v295_v29 = vld [vmem:[#allocation2 + $0x2] sm:$0xff]  ;;  %v61_v31 = vpack.c.bf16 %v59_v27, %v58_v26  ;;  %v297_v40 = vld [vmem:[#allocation2 + $0x1a] sm:$0xff] }
  0x34   :  { %v299_v32 = vpack.c.bf16 %v296_v30, %v295_v29  ;;  %v1301_v38 = vld [vmem:[#allocation6 + $0xb0] sm:$0xff]   ;;  %v1302_v39 = vld [vmem:[#allocation6 + $0xb8] sm:$0xff]  }
  0x35   :  { %1140 = vmatpush3.bf16.msra.mxu0 %v1282_v4  ;;  %v298_v41 = vld [vmem:[#allocation2 + $0x22] sm:$0xff] }
  0x36   :  { %1141 = vmatprep.subr.bf16.mxu0 %v1283_v10  ;;  %v300_v42 = vpack.c.bf16 %v298_v41, %v297_v40 }
  0x39   :  { %1142 = vmatpush3.bf16.msra.mxu0 %v1283_v10 }
  0x3a   :  { %1143 = vmatprep.subr.bf16.mxu0 %v1284_v11 }
  0x3d   :  { %1144 = vmatpush3.bf16.msra.mxu0 %v1284_v11 }
  0x3e   :  { %1145 = vmatprep.subr.bf16.mxu0 %v1285_v12 }
  0x41   :  { %1146 = vmatpush3.bf16.msra.mxu0 %v1285_v12 }
  0x42   :  { %1147 = vmatprep.subr.bf16.mxu0 %v1286_v13 }
  0x45   :  { %1148 = vmatpush3.bf16.msra.mxu0 %v1286_v13 }
  0x46   :  { %1153 = vmatprep.subr.bf16.mxu0 %v1287_v14 }
  0x48   :  { %1150 = vmatmul.mubr.bf16.vlgmr.msra.gmra.mrb[0].mxu0 %v83_v17  ;;  %v1303_v17 = vld [vmem:[#allocation6 + $0x100] sm:$0xff]  }
  0x49   :  { %1154 = vmatpush3.bf16.msra.mxu0 %v1287_v14  ;;  %1169 = vmatprep.mubr.bf16.mxu0 %v60_v19  ;;  %v1305_v19 = vld [vmem:[#allocation6 + $0x110] sm:$0xff]  }
  0x4a   :  { %1155 = vmatprep.subr.bf16.mxu0 %v1288_v18  ;;  %1193 = vmatprep.subr.bf16.mxu1 %v1303_v17 }
  0x4b   :  { %1194 = vmatpush3.bf16.msra.mxu1 %v1303_v17 }
  0x4d   :  { %1156 = vmatpush3.bf16.msra.mxu0 %v1288_v18  ;;  %v1304_v18 = vld [vmem:[#allocation6 + $0x108] sm:$0xff]  }
  0x4e   :  { %1157 = vmatprep.subr.bf16.mxu0 %v1289_v20  ;;  %1195 = vmatprep.subr.bf16.mxu1 %v1304_v18 }
  0x4f   :  { %1196 = vmatpush3.bf16.msra.mxu1 %v1304_v18  ;;  %v1314_v18 = vld [vmem:[#allocation6 + $0xd8] sm:$0xff]  }
  0x50   :  { %1197 = vmatprep.subr.bf16.mxu1 %v1305_v19 }
  0x51   :  { %1158 = vmatpush3.bf16.msra.mxu0 %v1289_v20  ;;  %v1306_v20 = vld [vmem:[#allocation6 + $0x118] sm:$0xff]  }
  0x52   :  { %1159 = vmatprep.subr.bf16.mxu0 %v1290_v21 }
  0x53   :  { %1198 = vmatpush3.bf16.msra.mxu1 %v1305_v19  ;;  %v1315_v19 = vld [vmem:[#allocation6 + $0xe0] sm:$0xff]  }
  0x54   :  { %1199 = vmatprep.subr.bf16.mxu1 %v1306_v20 }
  0x55   :  { %1160 = vmatpush3.bf16.msra.mxu0 %v1290_v21  ;;  %v1307_v21 = vld [vmem:[#allocation6 + $0x120] sm:$0xff]  }
  0x56   :  { %1161 = vmatprep.subr.bf16.mxu0 %v1291_v22 }
  0x57   :  { %1200 = vmatpush3.bf16.msra.mxu1 %v1306_v20  ;;  %v1316_v20 = vld [vmem:[#allocation6 + $0xe8] sm:$0xff]  }
  0x58   :  { %1201 = vmatprep.subr.bf16.mxu1 %v1307_v21 }
  0x59   :  { %1162 = vmatpush3.bf16.msra.mxu0 %v1291_v22  ;;  %v1308_v22 = vld [vmem:[#allocation6 + $0x128] sm:$0xff]  }
  0x5a   :  { %1163 = vmatprep.subr.bf16.mxu0 %v1292_v23 }
  0x5b   :  { %1202 = vmatpush3.bf16.msra.mxu1 %v1307_v21  ;;  %v1317_v21 = vld [vmem:[#allocation6 + $0xf0] sm:$0xff]  }
  0x5c   :  { %1203 = vmatprep.subr.bf16.mxu1 %v1308_v22 }
  0x5d   :  { %1164 = vmatpush3.bf16.msra.mxu0 %v1292_v23  ;;  %v1309_v23 = vld [vmem:[#allocation6 + $0x130] sm:$0xff]  }
  0x5e   :  { %1165 = vmatprep.subr.bf16.mxu0 %v1293_v24 }
  0x5f   :  { %1204 = vmatpush3.bf16.msra.mxu1 %v1308_v22  ;;  %v1318_v22 = vld [vmem:[#allocation6 + $0xf8] sm:$0xff]  }
  0x60   :  { %1205 = vmatprep.subr.bf16.mxu1 %v1309_v23 }
  0x61   :  { %1166 = vmatpush3.bf16.msra.mxu0 %v1293_v24  ;;  %v1310_v24 = vld [vmem:[#allocation6 + $0x138] sm:$0xff]  }
  0x62   :  { %1167 = vmatprep.subr.bf16.mxu0 %v1294_v25 }
  0x63   :  { %1206 = vmatpush3.bf16.msra.mxu1 %v1309_v23  ;;  %v1319_v23 = vld [vmem:[#allocation6 + $0x140] sm:$0xff]  }
  0x64   :  { %1207 = vmatprep.subr.bf16.mxu1 %v1310_v24 }
  0x65   :  { %1168 = vmatpush3.bf16.msra.mxu0 %v1294_v25  ;;  %v1506_v25 = vld [vmem:[#allocation6 + $0xc0] sm:$0xff]  }
  0x66   :  { %1173 = vmatprep.subr.bf16.mxu0 %v1295_v28 }
  0x67   :  { %1208 = vmatpush3.bf16.msra.mxu1 %v1310_v24 }
  0x68   :  { %1170 = vmatmul.mubr.bf16.vlgmr.msra.gmra.mrb[0].mxu0 %v61_v31  ;;  %1213 = vmatprep.subr.bf16.mxu1 %v1506_v25 }
  0x69   :  { %1174 = vmatpush3.bf16.msra.mxu0 %v1295_v28  ;;  %1189 = vmatprep.mubr.bf16.mxu0 %v299_v32 }
  0x6a   :  { %1175 = vmatprep.subr.bf16.mxu0 %v1296_v33 }
  0x6d   :  { %1176 = vmatpush3.bf16.msra.mxu0 %v1296_v33 }
  0x6e   :  { %1177 = vmatprep.subr.bf16.mxu0 %v1297_v34 }
  0x71   :  { %1178 = vmatpush3.bf16.msra.mxu0 %v1297_v34 }
  0x72   :  { %1179 = vmatprep.subr.bf16.mxu0 %v1298_v35 }
  0x75   :  { %1180 = vmatpush3.bf16.msra.mxu0 %v1298_v35 }
  0x76   :  { %1181 = vmatprep.subr.bf16.mxu0 %v1299_v36 }
  0x79   :  { %1182 = vmatpush3.bf16.msra.mxu0 %v1299_v36  ;;  %v477_v36 = vlaneseq }
  0x7a   :  { %1183 = vmatprep.subr.bf16.mxu0 %v1300_v37 }
  0x7d   :  { %1184 = vmatpush3.bf16.msra.mxu0 %v1300_v37  ;;  %v478_v37 = vshrl.u32 %v477_v36, 7  ;;  %v1326_v36 = vld [vmem:[#allocation6 + $0x178] sm:$0xff]  }
  0x7e   :  { %1185 = vmatprep.subr.bf16.mxu0 %v1301_v38 }
  0x81   :  { %1186 = vmatpush3.bf16.msra.mxu0 %v1301_v38  ;;  %v470_v38 = vld [vmem:[%s1575_s2] sm:$0x1] }
  0x82   :  { %1187 = vmatprep.subr.bf16.mxu0 %v1302_v39 }
  0x85   :  { %1188 = vmatpush3.bf16.msra.mxu0 %v1302_v39  ;;  %v1512_v39 = vsub.s32 0, %v478_v37 }
  0x88   :  { %1190 = vmatmul.mubr.bf16.vlgmr.msra.gmra.mrb[0].mxu0 %v300_v42  ;;  %v471_v42 = vld [vmem:[%s1575_s2 + $0x1] sm:$0x1] }
 0x15b   :  { %v1478_v43 = vpop.f32.mrb[0].mxu0 }
 0x15c   :  { %v1480_v44 = vpop.f32.mrb[1].mxu0  ;;  %v430_v50 = vmul.f32 %v1478_v43, %v1478_v43 }
 0x15d   :  { %v1482_v45 = vpop.f32.mrb[2].mxu0  ;;  %v428_v47 = vmul.f32 %v1480_v44, %v1480_v44 }
 0x15e   :  { %v1484_v46 = vpop.f32.mrb[3].mxu0  ;;  %v431_v53 = vmul.f32 %v1482_v45, %v1482_v45 }
 0x15f   :  { %v419_v48 = vadd.f32 %v1484_v46, %v1480_v44  ;;  %v429_v49 = vmul.f32 %v1484_v46, %v1484_v46 }
 0x161   :  { %v420_v51 = vadd.f32 %v1478_v43, %v419_v48  ;;  %v432_v52 = vadd.f32 %v429_v49, %v428_v47 }
 0x163   :  { %v421_v54 = vadd.f32 %v1482_v45, %v420_v51  ;;  %v433_v55 = vadd.f32 %v432_v52, %v430_v50 }
 0x165   :  { %v422_v56 = vrot.slane %v421_v54, 4  ;;  %v434_v57 = vadd.f32 %v433_v55, %v431_v53 }
 0x167   :  { %v423_v58 = vadd.f32 %v422_v56, %v421_v54  ;;  %v435_v59 = vrot.slane %v434_v57, 4 }
 0x169   :  { %v424_v60 = vrot.slane %v423_v58, 2  ;;  %v436_v61 = vadd.f32 %v435_v59, %v434_v57 }
 0x16b   :  { %v425_v62 = vadd.f32 %v424_v60, %v423_v58  ;;  %v437_v63 = vrot.slane %v436_v61, 2 }
 0x16d   :  { %v426_v0 = vrot.slane %v425_v62, 1  ;;  %v438_v1 = vadd.f32 %v437_v63, %v436_v61 }
 0x16f   :  { %v427_v2 = vadd.f32 %v426_v0, %v425_v62  ;;  %v439_v3 = vrot.slane %v438_v1, 1 }
 0x171   :  { %441 = vrot.lane.b32.xlu0 %v427_v2, %s1421_s23  ;;  %v440_v4 = vadd.f32 %v439_v3, %v438_v1 }
 0x175   :  { %444 = vrot.lane.b32.xlu0 %v440_v4, %s1421_s23 }
 0x1e3   :  { %v442_v5 = vpop.permute.xlu0 %441 }
 0x1e4   :  { %v443_v6 = vadd.f32 %v442_v5, %v427_v2 }
 0x1e6   :  { %447 = vrot.lane.b32.xlu1 %v443_v6, %s1426_s1 }
 0x1e7   :  { %v445_v7 = vpop.permute.xlu0 %444 }
 0x1e8   :  { %v446_v8 = vadd.f32 %v445_v7, %v440_v4 }
 0x1ea   :  { %450 = vrot.lane.b32.xlu1 %v446_v8, %s1426_s1 }
 0x258   :  { %v448_v9 = vpop.permute.xlu1 %447 }
 0x259   :  { %v449_v10 = vadd.f32 %v448_v9, %v443_v6 }
 0x25b   :  { %453 = vrot.lane.b32.xlu0 %v449_v10, %s1427_s12 }
 0x25c   :  { %v451_v11 = vpop.permute.xlu1 %450 }
 0x25d   :  { %v452_v12 = vadd.f32 %v451_v11, %v446_v8 }
 0x25f   :  { %456 = vrot.lane.b32.xlu1 %v452_v12, %s1427_s12 }
 0x2cd   :  { %v454_v13 = vpop.permute.xlu0 %453 }
 0x2ce   :  { %v455_v14 = vadd.f32 %v454_v13, %v449_v10  ;;  %v1312_v13 = vld [vmem:[#allocation6 + $0xc8] sm:$0xff]  }
 0x2d0   :  { %459 = vrot.lane.b32.xlu0 %v455_v14, %s1423_s0 }
 0x2d1   :  { %v457_v15 = vpop.permute.xlu1 %456 }
 0x2d2   :  { %v458_v16 = vadd.f32 %v457_v15, %v452_v12  ;;  %v1313_v15 = vld [vmem:[#allocation6 + $0xd0] sm:$0xff]  }
 0x2d4   :  { %462 = vrot.lane.b32.xlu1 %v458_v16, %s1423_s0 }
 0x342   :  { %v460_v26 = vpop.permute.xlu0 %459 }
 0x343   :  { %v461_v27 = vadd.f32 %v460_v26, %v455_v14 }
 0x345   :  { %v465_v28 = vmul.f32 0.001953125, %v461_v27 }
 0x346   :  { %v463_v29 = vpop.permute.xlu1 %462 }
 0x347   :  { %v464_v30 = vadd.f32 %v463_v29, %v458_v16  ;;  %v467_v31 = vmul.f32 %v465_v28, %v465_v28  ;;  %v1320_v29 = vld [vmem:[#allocation6 + $0x148] sm:$0xff]  }
 0x349   :  { %v466_v32 = vmul.f32 0.001953125, %v464_v30 }
 0x34b   :  { %v468_v33 = vsub.f32 %v466_v32, %v467_v31  ;;  %v1321_v31 = vld [vmem:[#allocation6 + $0x150] sm:$0xff]   ;;  %v1322_v32 = vld [vmem:[#allocation6 + $0x158] sm:$0xff]  }
 0x34d   :  { %v469_v34 = vmax.f32 %v468_v33, 0.0  ;;  %v1323_v33 = vld [vmem:[#allocation6 + $0x160] sm:$0xff]  }
 0x34f   :  { %v472_v35 = vadd.f32 1e-05, %v469_v34  ;;  %v1324_v34 = vld [vmem:[#allocation6 + $0x168] sm:$0xff]  }
 0x351   :  { %1327 = vrsqrt.f32 %v472_v35  ;;  %v1325_v35 = vld [vmem:[#allocation6 + $0x170] sm:$0xff]  }
 0x35b   :  { %v1328_v40 = vpop.eup %1327 }
 0x35c   :  { %v474_v41 = vmul.f32 %v1328_v40, %v470_v38 }
 0x35e   :  { %v475_v47 = vmul.f32 %v474_v41, %v465_v28  ;;  %v480_v48 = vrot.slane %v474_v41, %v1512_v39 }
 0x360   :  { %v476_v49 = vsub.f32 %v471_v42, %v475_v47  ;;  %v481_v50 = vmul.f32 %v480_v48, %v1480_v44  ;;  %v482_v51 = vmul.f32 %v480_v48, %v1484_v46  ;;  %v483_v52 = vmul.f32 %v1478_v43, %v480_v48 }
 0x361   :  { %v484_v53 = vmul.f32 %v1482_v45, %v480_v48 }
 0x362   :  { %v488_v54 = vrot.slane %v476_v49, %v1512_v39 }
 0x364   :  { %v489_v55 = vadd.f32 %v488_v54, %v481_v50  ;;  %v490_v56 = vadd.f32 %v488_v54, %v482_v51  ;;  %v491_v57 = vadd.f32 %v488_v54, %v483_v52  ;;  %v492_v58 = vadd.f32 %v488_v54, %v484_v53 }
 0x366   :  { %v497_v59 = vmin.f32 %v489_v55, 0.0  ;;  %v498_v60 = vmin.f32 %v490_v56, 0.0  ;;  %v499_v61 = vmin.f32 %v491_v57, 0.0  ;;  %v500_v62 = vmin.f32 %v492_v58, 0.0 }
 0x367   :  { %vm493_vm0 = vcmp.gt.f32.partialorder %v489_v55, 0.0  ;;  %vm494_vm1 = vcmp.gt.f32.partialorder %v490_v56, 0.0  ;;  %vm495_vm2 = vcmp.gt.f32.partialorder %v491_v57, 0.0  ;;  %vm496_vm3 = vcmp.gt.f32.partialorder %v492_v58, 0.0 }
 0x368   :  { %v501_v63 = vmul.f32 1.442695, %v497_v59  ;;  %v503_v0 = vmul.f32 1.442695, %v498_v60  ;;  %v505_v1 = vmul.f32 1.442695, %v499_v61 }
 0x369   :  { %v507_v44 = vmul.f32 1.442695, %v500_v62 }
 0x36a   :  { %1329 = vpow2.f32 %v501_v63 }
 0x36b   :  { %1331 = vpow2.f32 %v503_v0 }
 0x36c   :  { %1333 = vpow2.f32 %v505_v1 }
 0x36d   :  { %1335 = vpow2.f32 %v507_v44 }
 0x374   :  { %v1330_v43 = vpop.eup %1329 }
 0x375   :  { %v1332_v45 = vpop.eup %1331  ;;  %v1041_v46 = vadd.f32 -1.0, %v1330_v43 }
 0x376   :  { %v1334_v2 = vpop.eup %1333  ;;  %v1042_v3 = vadd.f32 -1.0, %v1332_v45 }
 0x377   :  { %v1336_v4 = vpop.eup %1335  ;;  %v1043_v5 = vadd.f32 -1.0, %v1334_v2  ;;  %v513_v6 = vsel %vm493_vm0, %v489_v55, %v1041_v46 }
 0x378   :  { %v1044_v7 = vadd.f32 -1.0, %v1336_v4  ;;  %v514_v8 = vsel %vm494_vm1, %v490_v56, %v1042_v3  ;;  %517 = vst [vmem:[#allocation2 + $0x1] sm:$0xff] %v513_v6 }
 0x379   :  { %v515_v9 = vsel %vm495_vm2, %v491_v57, %v1043_v5  ;;  %518 = vst [vmem:[#allocation2 + $0x9] sm:$0xff] %v514_v8  ;;  %v548_v10 = vpack.c.bf16 %v514_v8, %v513_v6 }
 0x37a   :  { %v516_v11 = vsel %vm496_vm3, %v492_v58, %v1044_v7  ;;  %519 = vst [vmem:[#allocation2 + $0x19] sm:$0xff] %v515_v9 }
 0x37b   :  { %520 = vst [vmem:[#allocation2 + $0x21] sm:$0xff] %v516_v11  ;;  %1209 = vmatprep.mubr.bf16.mxu1 %v548_v10  ;;  %v549_v12 = vpack.c.bf16 %v516_v11, %v515_v9 }
 0x37d   :  { %1210 = vmatmul.mubr.bf16.vlgmr.msra.gmra.mrb[0].mxu1 %v549_v12 }
 0x37e   :  { %1214 = vmatpush3.bf16.msra.mxu1 %v1506_v25 }
 0x37f   :  { %v521_v14 = vld [vmem:[#allocation2] sm:$0xff]  ;;  %1215 = vmatprep.subr.bf16.mxu1 %v1312_v13 }
 0x380   :  { %v522_v16 = vld [vmem:[#allocation2 + $0x8] sm:$0xff] }
 0x381   :  { %v525_v17 = vpack.c.bf16 %v522_v16, %v521_v14  ;;  %v523_v24 = vld [vmem:[#allocation2 + $0x18] sm:$0xff]  ;;  %v761_v26 = vld [vmem:[#allocation2 + $0x2] sm:$0xff]  ;;  %v762_v27 = vld [vmem:[#allocation2 + $0xa] sm:$0xff] }
 0x382   :  { %1216 = vmatpush3.bf16.msra.mxu1 %v1312_v13  ;;  %v524_v25 = vld [vmem:[#allocation2 + $0x20] sm:$0xff]  ;;  %v765_v30 = vpack.c.bf16 %v762_v27, %v761_v26 }
 0x383   :  { %1229 = vmatprep.mubr.bf16.mxu1 %v525_v17  ;;  %1217 = vmatprep.subr.bf16.mxu1 %v1313_v15  ;;  %v526_v28 = vpack.c.bf16 %v524_v25, %v523_v24  ;;  %v763_v37 = vld [vmem:[#allocation2 + $0x1a] sm:$0xff]  ;;  %v764_v38 = vld [vmem:[#allocation2 + $0x22] sm:$0xff] }
 0x384   :  { %v766_v40 = vpack.c.bf16 %v764_v38, %v763_v37  ;;  %v936_v25 = vld [vmem:[%s1575_s2 + $0x2] sm:$0x1] }
 0x386   :  { %1218 = vmatpush3.bf16.msra.mxu1 %v1313_v15 }
 0x387   :  { %1219 = vmatprep.subr.bf16.mxu1 %v1314_v18 }
 0x38a   :  { %1220 = vmatpush3.bf16.msra.mxu1 %v1314_v18 }
 0x38b   :  { %1221 = vmatprep.subr.bf16.mxu1 %v1315_v19 }
 0x38e   :  { %1222 = vmatpush3.bf16.msra.mxu1 %v1315_v19 }
 0x38f   :  { %1223 = vmatprep.subr.bf16.mxu1 %v1316_v20 }
 0x392   :  { %1224 = vmatpush3.bf16.msra.mxu1 %v1316_v20 }
 0x393   :  { %1225 = vmatprep.subr.bf16.mxu1 %v1317_v21 }
 0x396   :  { %1226 = vmatpush3.bf16.msra.mxu1 %v1317_v21 }
 0x397   :  { %1227 = vmatprep.subr.bf16.mxu1 %v1318_v22 }
 0x39a   :  { %1228 = vmatpush3.bf16.msra.mxu1 %v1318_v22 }
 0x39b   :  { %1233 = vmatprep.subr.bf16.mxu1 %v1319_v23 }
 0x39d   :  { %1230 = vmatmul.mubr.bf16.vlgmr.msra.gmra.mrb[0].mxu1 %v526_v28  ;;  %v937_v28 = vld [vmem:[%s1575_s2 + $0x3] sm:$0x1]  ;;  %s1428_s2 = smov [#allocation8]  }
 0x39e   :  { %1234 = vmatpush3.bf16.msra.mxu1 %v1319_v23  ;;  %1249 = vmatprep.mubr.bf16.mxu1 %v765_v30  ;;  %s1004_s21 = sshll.u32 %s1428_s2, 4  ;;  %s1005_s21 = int_to_ptr.vmem [resolvable:$true] %s1004_s21 }
 0x39f   :  { %1235 = vmatprep.subr.bf16.mxu1 %v1320_v29  ;;  %s1391_s24 = scalar_lea.vmem %s1005_s21, 256  ;;  %p1396_p3 = scmp.lt.s32.totalorder %s1005_s21, %s1005_s21 }
 0x3a0   :  { %p1392_p2 = scmp.ne.s32.totalorder %s1005_s21, %s1391_s24  ;;  %p1397_p4 = scmp.lt.s32.totalorder %s1391_s24, %s1391_s24 }
 0x3a2   :  { %1236 = vmatpush3.bf16.msra.mxu1 %v1320_v29  ;;  %p1398_p5 = por %p1397_p4, %p1396_p3 }
 0x3a3   :  { %1237 = vmatprep.subr.bf16.mxu1 %v1321_v31 }
 0x3a4   :  { %p1399_p6 = pnand %p1398_p5, %p1392_p2 }
 0x3a6   :  { %1238 = vmatpush3.bf16.msra.mxu1 %v1321_v31 }
 0x3a7   :  { %1239 = vmatprep.subr.bf16.mxu1 %v1322_v32 }
 0x3aa   :  { %1240 = vmatpush3.bf16.msra.mxu1 %v1322_v32 }
 0x3ab   :  { %1241 = vmatprep.subr.bf16.mxu1 %v1323_v33 }
 0x3ae   :  { %1242 = vmatpush3.bf16.msra.mxu1 %v1323_v33 }
 0x3af   :  { %1243 = vmatprep.subr.bf16.mxu1 %v1324_v34 }
 0x3b2   :  { %1244 = vmatpush3.bf16.msra.mxu1 %v1324_v34 }
 0x3b3   :  { %1245 = vmatprep.subr.bf16.mxu1 %v1325_v35 }
 0x3b6   :  { %1246 = vmatpush3.bf16.msra.mxu1 %v1325_v35 }
 0x3b7   :  { %1247 = vmatprep.subr.bf16.mxu1 %v1326_v36 }
 0x3ba   :  { %1248 = vmatpush3.bf16.msra.mxu1 %v1326_v36 }
 0x3bd   :  { %1250 = vmatmul.mubr.bf16.vlgmr.msra.gmra.mrb[0].mxu1 %v766_v40 }
 0x490   :  { %v1524_v41 = vpop.f32.mrb[0].mxu1 }
 0x491   :  { %v1526_v42 = vpop.f32.mrb[1].mxu1  ;;  %v896_v52 = vmul.f32 %v1524_v41, %v1524_v41 }
 0x492   :  { %v1528_v47 = vpop.f32.mrb[2].mxu1  ;;  %v894_v49 = vmul.f32 %v1526_v42, %v1526_v42 }
 0x493   :  { %v869_v48 = vpop.f32.mrb[3].mxu1  ;;  %v897_v55 = vmul.f32 %v1528_v47, %v1528_v47 }
 0x494   :  { %v885_v50 = vadd.f32 %v869_v48, %v1526_v42  ;;  %v895_v51 = vmul.f32 %v869_v48, %v869_v48 }
 0x496   :  { %v886_v53 = vadd.f32 %v1524_v41, %v885_v50  ;;  %v898_v54 = vadd.f32 %v895_v51, %v894_v49 }
 0x498   :  { %v887_v56 = vadd.f32 %v1528_v47, %v886_v53  ;;  %v899_v57 = vadd.f32 %v898_v54, %v896_v52 }
 0x49a   :  { %v888_v58 = vrot.slane %v887_v56, 4  ;;  %v900_v59 = vadd.f32 %v899_v57, %v897_v55 }
 0x49c   :  { %v889_v60 = vadd.f32 %v888_v58, %v887_v56  ;;  %v901_v61 = vrot.slane %v900_v59, 4 }
 0x49e   :  { %v890_v62 = vrot.slane %v889_v60, 2  ;;  %v902_v63 = vadd.f32 %v901_v61, %v900_v59 }
 0x4a0   :  { %v891_v0 = vadd.f32 %v890_v62, %v889_v60  ;;  %v903_v1 = vrot.slane %v902_v63, 2 }
 0x4a2   :  { %v892_v44 = vrot.slane %v891_v0, 1  ;;  %v904_v43 = vadd.f32 %v903_v1, %v902_v63 }
 0x4a4   :  { %v893_v45 = vadd.f32 %v892_v44, %v891_v0  ;;  %v905_v46 = vrot.slane %v904_v43, 1 }
 0x4a6   :  { %907 = vrot.lane.b32.xlu0 %v893_v45, %s1421_s23  ;;  %v906_v2 = vadd.f32 %v905_v46, %v904_v43 }
 0x4a8   :  { %910 = vrot.lane.b32.xlu1 %v906_v2, %s1421_s23 }
 0x518   :  { %v908_v3 = vpop.permute.xlu0 %907 }
 0x519   :  { %v909_v4 = vadd.f32 %v908_v3, %v893_v45 }
 0x51a   :  { %v911_v5 = vpop.permute.xlu1 %910 }
 0x51b   :  { %v912_v6 = vadd.f32 %v911_v5, %v906_v2  ;;  %913 = vrot.lane.b32.xlu0 %v909_v4, %s1426_s1 }
 0x51d   :  { %916 = vrot.lane.b32.xlu1 %v912_v6, %s1426_s1 }
 0x58d   :  { %v914_v7 = vpop.permute.xlu0 %913 }
 0x58e   :  { %v915_v8 = vadd.f32 %v914_v7, %v909_v4 }
 0x58f   :  { %v917_v9 = vpop.permute.xlu1 %916 }
 0x590   :  { %v918_v10 = vadd.f32 %v917_v9, %v912_v6  ;;  %919 = vrot.lane.b32.xlu0 %v915_v8, %s1427_s12 }
 0x592   :  { %922 = vrot.lane.b32.xlu1 %v918_v10, %s1427_s12 }
 0x602   :  { %v920_v11 = vpop.permute.xlu0 %919 }
 0x603   :  { %v921_v12 = vadd.f32 %v920_v11, %v915_v8 }
 0x604   :  { %v923_v13 = vpop.permute.xlu1 %922 }
 0x605   :  { %v924_v14 = vadd.f32 %v923_v13, %v918_v10  ;;  %925 = vrot.lane.b32.xlu0 %v921_v12, %s1423_s0 }
 0x607   :  { %928 = vrot.lane.b32.xlu1 %v924_v14, %s1423_s0 }
 0x677   :  { %v926_v15 = vpop.permute.xlu0 %925 }
 0x678   :  { %v927_v16 = vadd.f32 %v926_v15, %v921_v12 }
 0x679   :  { %v929_v17 = vpop.permute.xlu1 %928 }
 0x67a   :  { %v931_v18 = vmul.f32 0.001953125, %v927_v16  ;;  %v930_v19 = vadd.f32 %v929_v17, %v924_v14 }
 0x67c   :  { %v933_v20 = vmul.f32 %v931_v18, %v931_v18  ;;  %v932_v21 = vmul.f32 0.001953125, %v930_v19 }
 0x67e   :  { %v934_v22 = vsub.f32 %v932_v21, %v933_v20 }
 0x680   :  { %v935_v23 = vmax.f32 %v934_v22, 0.0 }
 0x682   :  { %v938_v24 = vadd.f32 1e-05, %v935_v23 }
 0x684   :  { %1337 = vrsqrt.f32 %v938_v24 }
 0x68e   :  { %v1338_v26 = vpop.eup %1337 }
 0x68f   :  { %v940_v27 = vmul.f32 %v1338_v26, %v936_v25 }
 0x691   :  { %v941_v29 = vmul.f32 %v940_v27, %v931_v18  ;;  %v946_v30 = vrot.slane %v940_v27, %v1512_v39 }
 0x693   :  { %v942_v31 = vsub.f32 %v937_v28, %v941_v29  ;;  %v947_v32 = vmul.f32 %v946_v30, %v1526_v42  ;;  %v948_v33 = vmul.f32 %v946_v30, %v869_v48  ;;  %v949_v34 = vmul.f32 %v1524_v41, %v946_v30 }
 0x694   :  { %v950_v35 = vmul.f32 %v1528_v47, %v946_v30 }
 0x695   :  { %v954_v36 = vrot.slane %v942_v31, %v1512_v39 }
 0x697   :  { %v955_v37 = vadd.f32 %v954_v36, %v947_v32  ;;  %v956_v38 = vadd.f32 %v954_v36, %v948_v33  ;;  %v957_v40 = vadd.f32 %v954_v36, %v949_v34  ;;  %v958_v49 = vadd.f32 %v954_v36, %v950_v35 }
 0x699   :  { %v963_v50 = vmin.f32 %v955_v37, 0.0  ;;  %v964_v51 = vmin.f32 %v956_v38, 0.0  ;;  %v965_v52 = vmin.f32 %v957_v40, 0.0  ;;  %v966_v53 = vmin.f32 %v958_v49, 0.0 }
 0x69a   :  { %vm959_vm4 = vcmp.gt.f32.partialorder %v955_v37, 0.0  ;;  %vm960_vm5 = vcmp.gt.f32.partialorder %v956_v38, 0.0  ;;  %vm961_vm6 = vcmp.gt.f32.partialorder %v957_v40, 0.0  ;;  %vm962_vm7 = vcmp.gt.f32.partialorder %v958_v49, 0.0 }
 0x69b   :  { %v967_v54 = vmul.f32 1.442695, %v963_v50  ;;  %v969_v55 = vmul.f32 1.442695, %v964_v51  ;;  %v971_v56 = vmul.f32 1.442695, %v965_v52 }
 0x69c   :  { %v973_v57 = vmul.f32 1.442695, %v966_v53 }
 0x69d   :  { %1339 = vpow2.f32 %v967_v54 }
 0x69e   :  { %1341 = vpow2.f32 %v969_v55 }
 0x69f   :  { %1343 = vpow2.f32 %v971_v56 }
 0x6a0   :  { %1345 = vpow2.f32 %v973_v57 }
 0x6a7   :  { %v1340_v41 = vpop.eup %1339 }
 0x6a8   :  { %v1342_v42 = vpop.eup %1341  ;;  %v1069_v47 = vadd.f32 -1.0, %v1340_v41 }
 0x6a9   :  { %v1344_v39 = vpop.eup %1343  ;;  %v1070_v48 = vadd.f32 -1.0, %v1342_v42 }
 0x6aa   :  { %v1346_v58 = vpop.eup %1345  ;;  %v1071_v59 = vadd.f32 -1.0, %v1344_v39  ;;  %v979_v60 = vsel %vm959_vm4, %v955_v37, %v1069_v47 }
 0x6ab   :  { %v1072_v61 = vadd.f32 -1.0, %v1346_v58  ;;  %v980_v62 = vsel %vm960_vm5, %v956_v38, %v1070_v48  ;;  %983 = vst [vmem:[#allocation2 + $0x1] sm:$0xff] %v979_v60 }
 0x6ac   :  { %v981_v63 = vsel %vm961_vm6, %v957_v40, %v1071_v59  ;;  %984 = vst [vmem:[#allocation2 + $0x9] sm:$0xff] %v980_v62 }
 0x6ad   :  { %v982_v0 = vsel %vm962_vm7, %v958_v49, %v1072_v61  ;;  %985 = vst [vmem:[#allocation2 + $0x19] sm:$0xff] %v981_v63 }
 0x6ae   :  { %986 = vst [vmem:[#allocation2 + $0x21] sm:$0xff] %v982_v0 }
 0x6b3   :  { %v988_v1 = vld [vmem:[#allocation2 + $0x1] ss:$2 sm:$0xff]  ;;  %v992_v44 = vld [vmem:[#allocation2 + $0x2] ss:$2 sm:$0xff] }
 0x6b4   :  { %v995_v43 = vmax.f32 %v988_v1, %v992_v44 }
 0x6b5   :  { %v990_v45 = vld [vmem:[#allocation2 + $0x19] ss:$2 sm:$0xff]  ;;  %v994_v46 = vld [vmem:[#allocation2 + $0x1a] ss:$2 sm:$0xff] }
 0x6b6   :  { %v996_v2 = vmax.f32 %v990_v45, %v994_v46  ;;  %997 = vst [vmem:[#allocation8] sm:$0xff] %v995_v43 }
 0x6b8   :  { %998 = vst [vmem:[#allocation8 + $0x8] sm:$0xff] %v996_v2 }
 0x6b9   :  { %1402 = shalt.err (!%p1399_p6)
}
 0x6ba   :  { %s1403_s27 = scalar_lea.hbm %s1576_s3, 256 }
 0x6bb   :  { %p1404_p7 = scmp.ne.s32.totalorder %s1576_s3, %s1403_s27  ;;  %p1407_p8 = scmp.lt.u32.totalorder %s1403_s27, %s1576_s3 }
 0x6bd   :  { %p1409_p9 = pnand %p1407_p8, %p1404_p7 }
 0x6bf   :  { %1412 = shalt.err (!%p1409_p9)
}
 0x6c0   :  { %1010 = dma.vmem_to_hbm [thread:$0]  %s1005_s21, 256, %s1576_s3, [#allocation5], %s1420_s22, %s1420_s22, %s1421_s23  }
 0x6c1   :  { %1417 = dma.done.wait [#allocation5], 256  }
 0x6c2   :  { %1418 = vsyncadd [#allocation5], 4294967040 }
 0x6c3   :  { %1014 = vsyncpa [#allocation4], 1 }
 0x6c4   :  { %1015 = vsyncpa [#allocation7], 1 }
 0x6c5   :  { %1016 = vsyncpa [#allocation5], 1 }

</bundles_post_ra>
